<compile_context>
chip_gen: v5e
topology: v5e:2x2
jax: 0.10.0
libtpu: 0.0.40
codegen_flags: <defaults>
</compile_context>

<pallas_src>
import functools

import jax
import jax.numpy as jnp
import numpy as np
from jax.experimental import pallas as pl
from jax.experimental.pallas import tpu as pltpu


def _spatial_attention_kernel(w_ref, m_ref, x_ref, o_ref, *, H, W):
    # w_ref : SMEM (18,) f32   conv weight flattened from (out=1, in=2, 3, 3);
    #                          w[0:9] -> taps on the channel-mean map,
    #                          w[9:18] -> taps on the channel-max map.
    # m_ref : VMEM (9, H*W) f32   per-tap boundary masks (1 inside, 0 = pad).
    # x_ref : VMEM (Bt, C, H*W)   input block (lane-dense).
    # o_ref : VMEM (Bt, C, H*W)   output block.
    Bt, C, HW = x_ref.shape

    x = x_ref[...]                                               # (Bt, C, HW)

    # Channel-wise mean / max (f32 accumulation), lane-dense (Bt, HW) maps.
    mean_map = jnp.sum(x, axis=1, dtype=jnp.float32) * jnp.float32(1.0 / C)
    max_map = jnp.max(x, axis=1).astype(jnp.float32)

    # Hoist all 18 scalar weights out of the tap loop.
    wm = [w_ref[k] for k in range(9)]
    wx = [w_ref[9 + k] for k in range(9)]

    # 3x3 conv with padding=1 as 9 masked lane-rolls of the flat maps.
    # For tap (ky, kx): shifted[p] = map[(p + ky*W + kx) mod HW], which equals
    # map[y+ky, x+kx] wherever the precomputed mask is 1 (inside the image).
    att = jnp.zeros((Bt, HW), jnp.float32)
    k = 0
    for ky in (-1, 0, 1):
        for kx in (-1, 0, 1):
            shift = (-(ky * W + kx)) % HW
            if shift == 0:
                sm, sx = mean_map, max_map
            else:
                sm = pltpu.roll(mean_map, shift=shift, axis=1)
                sx = pltpu.roll(max_map, shift=shift, axis=1)
            tap = wm[k] * sm + wx[k] * sx                        # (Bt, HW)
            mask = m_ref[k:k + 1, :]                             # (1, HW)
            att = att + tap * mask
            k += 1

    # out = x + x * sigmoid(att)  ==  x * (1 + sigmoid(att))
    gate = (1.0 + jax.nn.sigmoid(att)).astype(o_ref.dtype)       # (Bt, HW)
    o_ref[...] = x_ref[...] * gate[:, None, :]


def _conv_tap_masks(H, W):
    """(9, H*W) float32: 1.0 where the (ky,kx) neighbour is inside the image."""
    row = np.repeat(np.arange(H), W)
    col = np.tile(np.arange(W), H)
    masks = np.zeros((9, H * W), np.float32)
    k = 0
    for ky in (-1, 0, 1):
        for kx in (-1, 0, 1):
            valid = ((row + ky >= 0) & (row + ky < H) &
                     (col + kx >= 0) & (col + kx < W))
            masks[k] = valid.astype(np.float32)
            k += 1
    return jnp.asarray(masks)


def spatial_attention(x, conv_w, *, max_block_bytes=6 * 1024 * 1024):
    """x: (B, C, H, W); conv_w: (1, 2, 3, 3) (PyTorch OIHW, no bias)."""
    B, C, H, W = x.shape
    HW = H * W

    x_flat = x.reshape(B, C, HW)                       # free, contiguous
    w_flat = conv_w.reshape(-1).astype(jnp.float32)    # (18,)
    masks = _conv_tap_masks(H, W)                      # (9, HW) f32

    # Largest batch tile Bt (divisor of B) whose block fits the VMEM budget
    # (blocks are double-buffered for both input and output).
    bytes_per_sample = C * HW * x.dtype.itemsize
    bt = 1
    for cand in range(B, 0, -1):
        if B % cand == 0 and cand * bytes_per_sample <= max_block_bytes:
            bt = cand
            break

    kernel = functools.partial(_spatial_attention_kernel, H=H, W=W)

    out_flat = pl.pallas_call(
        kernel,
        out_shape=jax.ShapeDtypeStruct((B, C, HW), x.dtype),
        grid=(B // bt,),
        in_specs=[
            pl.BlockSpec(memory_space=pltpu.MemorySpace.SMEM),   # weights
            pl.BlockSpec((9, HW), lambda b: (0, 0)),             # tap masks
            pl.BlockSpec((bt, C, HW), lambda b: (b, 0, 0)),      # x
        ],
        out_specs=pl.BlockSpec((bt, C, HW), lambda b: (b, 0, 0)),
        compiler_params=pltpu.CompilerParams(
            dimension_semantics=("parallel",),
            vmem_limit_bytes=40 * 1024 * 1024,
        ),
    )(w_flat, masks, x_flat)

    return out_flat.reshape(B, C, H, W)


def spatial_attention_ref(x, conv_w):
    """Pure-JAX reference mirroring the PyTorch forward."""
    mean_map = jnp.mean(x, axis=1, keepdims=True)
    max_map = jnp.max(x, axis=1, keepdims=True)
    cat = jnp.concatenate([mean_map, max_map], axis=1)            # (B,2,H,W)
    att = jax.lax.conv_general_dilated(
        cat, conv_w, window_strides=(1, 1), padding=((1, 1), (1, 1)),
        dimension_numbers=("NCHW", "OIHW", "NCHW"))
    att = jax.nn.sigmoid(att)                                     # (B,1,H,W)
    return x + x * att


if __name__ == "__main__":
    key = jax.random.PRNGKey(0)
    kx, kw = jax.random.split(key)

    B, C, H, W = 2, 4, 16, 16
    x = jax.random.normal(kx, (B, C, H, W), dtype=jnp.float32)

    # Conv weight shaped like nn.Conv2d(2, 1, 3, padding=1, bias=False).
    fan_in = 2 * 3 * 3
    bound = 1.0 / np.sqrt(fan_in)
    conv_w = jax.random.uniform(kw, (1, 2, 3, 3), dtype=jnp.float32,
                                minval=-bound, maxval=bound)

    out = spatial_attention(x, conv_w)
    out = jax.block_until_ready(out)

    ref = jax.block_until_ready(spatial_attention_ref(x, conv_w))
    np.testing.assert_allclose(np.asarray(out), np.asarray(ref),
                               rtol=1e-5, atol=1e-5)

    print("KERNEL_OK")
</pallas_src>

<mosaic_0001>
module attributes {stable_mosaic.version = 11 : i64} {
  func.func @_spatial_attention_kernel(%arg0: i32, %arg1: memref<18xf32, #tpu.memory_space<smem>>, %arg2: memref<9x256xf32, #tpu.memory_space<vmem>>, %arg3: memref<2x4x256xf32, #tpu.memory_space<vmem>>, %arg4: memref<2x4x256xf32, #tpu.memory_space<vmem>>) attributes {dimension_semantics = [#tpu.dimension_semantics<parallel>], iteration_bounds = array<i64: 1>, scalar_prefetch = 0 : i64, scratch_operands = 0 : i64, tpu.core_type = #tpu.core_type<tc>, window_params = [{transform_indices = @transform_0, window_bounds = array<i64: 18>}, {pipeline_mode = #tpu.pipeline_mode<synchronous>, transform_indices = @transform_1, window_bounds = array<i64: 9, 256>}, {transform_indices = @transform_2, window_bounds = array<i64: 2, 4, 256>}, {transform_indices = @transform_3, window_bounds = array<i64: 2, 4, 256>}]} {
    %c0 = arith.constant 0 : index
    %c0_0 = arith.constant 0 : index
    %c0_1 = arith.constant 0 : index
    %0 = vector.load %arg3[%c0, %c0_0, %c0_1] : memref<2x4x256xf32, #tpu.memory_space<vmem>>, vector<2x4x256xf32>
    %cst = arith.constant dense<0.000000e+00> : vector<2x256xf32>
    %1 = vector.multi_reduction <add>, %0, %cst [1] : vector<2x4x256xf32> to vector<2x256xf32>
    %cst_2 = arith.constant 2.500000e-01 : f32
    %2 = vector.broadcast %cst_2 : f32 to vector<2x256xf32>
    %3 = arith.mulf %1, %2 : vector<2x256xf32>
    %cst_3 = arith.constant dense<0xFF800000> : vector<2x256xf32>
    %4 = vector.multi_reduction <maximumf>, %0, %cst_3 [1] : vector<2x4x256xf32> to vector<2x256xf32>
    %c0_4 = arith.constant 0 : index
    %5 = memref.load %arg1[%c0_4] : memref<18xf32, #tpu.memory_space<smem>>
    %c1 = arith.constant 1 : index
    %6 = memref.load %arg1[%c1] : memref<18xf32, #tpu.memory_space<smem>>
    %c2 = arith.constant 2 : index
    %7 = memref.load %arg1[%c2] : memref<18xf32, #tpu.memory_space<smem>>
    %c3 = arith.constant 3 : index
    %8 = memref.load %arg1[%c3] : memref<18xf32, #tpu.memory_space<smem>>
    %c4 = arith.constant 4 : index
    %9 = memref.load %arg1[%c4] : memref<18xf32, #tpu.memory_space<smem>>
    %c5 = arith.constant 5 : index
    %10 = memref.load %arg1[%c5] : memref<18xf32, #tpu.memory_space<smem>>
    %c6 = arith.constant 6 : index
    %11 = memref.load %arg1[%c6] : memref<18xf32, #tpu.memory_space<smem>>
    %c7 = arith.constant 7 : index
    %12 = memref.load %arg1[%c7] : memref<18xf32, #tpu.memory_space<smem>>
    %c8 = arith.constant 8 : index
    %13 = memref.load %arg1[%c8] : memref<18xf32, #tpu.memory_space<smem>>
    %c9 = arith.constant 9 : index
    %14 = memref.load %arg1[%c9] : memref<18xf32, #tpu.memory_space<smem>>
    %c10 = arith.constant 10 : index
    %15 = memref.load %arg1[%c10] : memref<18xf32, #tpu.memory_space<smem>>
    %c11 = arith.constant 11 : index
    %16 = memref.load %arg1[%c11] : memref<18xf32, #tpu.memory_space<smem>>
    %c12 = arith.constant 12 : index
    %17 = memref.load %arg1[%c12] : memref<18xf32, #tpu.memory_space<smem>>
    %c13 = arith.constant 13 : index
    %18 = memref.load %arg1[%c13] : memref<18xf32, #tpu.memory_space<smem>>
    %c14 = arith.constant 14 : index
    %19 = memref.load %arg1[%c14] : memref<18xf32, #tpu.memory_space<smem>>
    %c15 = arith.constant 15 : index
    %20 = memref.load %arg1[%c15] : memref<18xf32, #tpu.memory_space<smem>>
    %c16 = arith.constant 16 : index
    %21 = memref.load %arg1[%c16] : memref<18xf32, #tpu.memory_space<smem>>
    %c17 = arith.constant 17 : index
    %22 = memref.load %arg1[%c17] : memref<18xf32, #tpu.memory_space<smem>>
    %cst_5 = arith.constant 0.000000e+00 : f32
    %23 = vector.broadcast %cst_5 : f32 to vector<2x256xf32>
    %c17_i32 = arith.constant 17 : i32
    %24 = tpu.dynamic_rotate %3 by %c17_i32 dim 1 : vector<2x256xf32>, i32 -> vector<2x256xf32>
    %c17_i32_6 = arith.constant 17 : i32
    %25 = tpu.dynamic_rotate %4 by %c17_i32_6 dim 1 : vector<2x256xf32>, i32 -> vector<2x256xf32>
    %26 = vector.broadcast %5 : f32 to vector<2x256xf32>
    %27 = arith.mulf %26, %24 : vector<2x256xf32>
    %28 = vector.broadcast %14 : f32 to vector<2x256xf32>
    %29 = arith.mulf %28, %25 : vector<2x256xf32>
    %30 = arith.addf %27, %29 : vector<2x256xf32>
    %c0_7 = arith.constant 0 : index
    %c0_8 = arith.constant 0 : index
    %31 = vector.load %arg2[%c0_7, %c0_8] : memref<9x256xf32, #tpu.memory_space<vmem>>, vector<1x256xf32>
    %32 = vector.broadcast %31 : vector<1x256xf32> to vector<2x256xf32>
    %33 = arith.mulf %30, %32 : vector<2x256xf32>
    %34 = arith.addf %23, %33 : vector<2x256xf32>
    %c16_i32 = arith.constant 16 : i32
    %35 = tpu.dynamic_rotate %3 by %c16_i32 dim 1 : vector<2x256xf32>, i32 -> vector<2x256xf32>
    %c16_i32_9 = arith.constant 16 : i32
    %36 = tpu.dynamic_rotate %4 by %c16_i32_9 dim 1 : vector<2x256xf32>, i32 -> vector<2x256xf32>
    %37 = vector.broadcast %6 : f32 to vector<2x256xf32>
    %38 = arith.mulf %37, %35 : vector<2x256xf32>
    %39 = vector.broadcast %15 : f32 to vector<2x256xf32>
    %40 = arith.mulf %39, %36 : vector<2x256xf32>
    %41 = arith.addf %38, %40 : vector<2x256xf32>
    %c1_10 = arith.constant 1 : index
    %c0_11 = arith.constant 0 : index
    %42 = vector.load %arg2[%c1_10, %c0_11] : memref<9x256xf32, #tpu.memory_space<vmem>>, vector<1x256xf32>
    %43 = vector.broadcast %42 : vector<1x256xf32> to vector<2x256xf32>
    %44 = arith.mulf %41, %43 : vector<2x256xf32>
    %45 = arith.addf %34, %44 : vector<2x256xf32>
    %c15_i32 = arith.constant 15 : i32
    %46 = tpu.dynamic_rotate %3 by %c15_i32 dim 1 : vector<2x256xf32>, i32 -> vector<2x256xf32>
    %c15_i32_12 = arith.constant 15 : i32
    %47 = tpu.dynamic_rotate %4 by %c15_i32_12 dim 1 : vector<2x256xf32>, i32 -> vector<2x256xf32>
    %48 = vector.broadcast %7 : f32 to vector<2x256xf32>
    %49 = arith.mulf %48, %46 : vector<2x256xf32>
    %50 = vector.broadcast %16 : f32 to vector<2x256xf32>
    %51 = arith.mulf %50, %47 : vector<2x256xf32>
    %52 = arith.addf %49, %51 : vector<2x256xf32>
    %c2_13 = arith.constant 2 : index
    %c0_14 = arith.constant 0 : index
    %53 = vector.load %arg2[%c2_13, %c0_14] : memref<9x256xf32, #tpu.memory_space<vmem>>, vector<1x256xf32>
    %54 = vector.broadcast %53 : vector<1x256xf32> to vector<2x256xf32>
    %55 = arith.mulf %52, %54 : vector<2x256xf32>
    %56 = arith.addf %45, %55 : vector<2x256xf32>
    %c1_i32 = arith.constant 1 : i32
    %57 = tpu.dynamic_rotate %3 by %c1_i32 dim 1 : vector<2x256xf32>, i32 -> vector<2x256xf32>
    %c1_i32_15 = arith.constant 1 : i32
    %58 = tpu.dynamic_rotate %4 by %c1_i32_15 dim 1 : vector<2x256xf32>, i32 -> vector<2x256xf32>
    %59 = vector.broadcast %8 : f32 to vector<2x256xf32>
    %60 = arith.mulf %59, %57 : vector<2x256xf32>
    %61 = vector.broadcast %17 : f32 to vector<2x256xf32>
    %62 = arith.mulf %61, %58 : vector<2x256xf32>
    %63 = arith.addf %60, %62 : vector<2x256xf32>
    %c3_16 = arith.constant 3 : index
    %c0_17 = arith.constant 0 : index
    %64 = vector.load %arg2[%c3_16, %c0_17] : memref<9x256xf32, #tpu.memory_space<vmem>>, vector<1x256xf32>
    %65 = vector.broadcast %64 : vector<1x256xf32> to vector<2x256xf32>
    %66 = arith.mulf %63, %65 : vector<2x256xf32>
    %67 = arith.addf %56, %66 : vector<2x256xf32>
    %68 = vector.broadcast %9 : f32 to vector<2x256xf32>
    %69 = arith.mulf %68, %3 : vector<2x256xf32>
    %70 = vector.broadcast %18 : f32 to vector<2x256xf32>
    %71 = arith.mulf %70, %4 : vector<2x256xf32>
    %72 = arith.addf %69, %71 : vector<2x256xf32>
    %c4_18 = arith.constant 4 : index
    %c0_19 = arith.constant 0 : index
    %73 = vector.load %arg2[%c4_18, %c0_19] : memref<9x256xf32, #tpu.memory_space<vmem>>, vector<1x256xf32>
    %74 = vector.broadcast %73 : vector<1x256xf32> to vector<2x256xf32>
    %75 = arith.mulf %72, %74 : vector<2x256xf32>
    %76 = arith.addf %67, %75 : vector<2x256xf32>
    %c255_i32 = arith.constant 255 : i32
    %77 = tpu.dynamic_rotate %3 by %c255_i32 dim 1 : vector<2x256xf32>, i32 -> vector<2x256xf32>
    %c255_i32_20 = arith.constant 255 : i32
    %78 = tpu.dynamic_rotate %4 by %c255_i32_20 dim 1 : vector<2x256xf32>, i32 -> vector<2x256xf32>
    %79 = vector.broadcast %10 : f32 to vector<2x256xf32>
    %80 = arith.mulf %79, %77 : vector<2x256xf32>
    %81 = vector.broadcast %19 : f32 to vector<2x256xf32>
    %82 = arith.mulf %81, %78 : vector<2x256xf32>
    %83 = arith.addf %80, %82 : vector<2x256xf32>
    %c5_21 = arith.constant 5 : index
    %c0_22 = arith.constant 0 : index
    %84 = vector.load %arg2[%c5_21, %c0_22] : memref<9x256xf32, #tpu.memory_space<vmem>>, vector<1x256xf32>
    %85 = vector.broadcast %84 : vector<1x256xf32> to vector<2x256xf32>
    %86 = arith.mulf %83, %85 : vector<2x256xf32>
    %87 = arith.addf %76, %86 : vector<2x256xf32>
    %c241_i32 = arith.constant 241 : i32
    %88 = tpu.dynamic_rotate %3 by %c241_i32 dim 1 : vector<2x256xf32>, i32 -> vector<2x256xf32>
    %c241_i32_23 = arith.constant 241 : i32
    %89 = tpu.dynamic_rotate %4 by %c241_i32_23 dim 1 : vector<2x256xf32>, i32 -> vector<2x256xf32>
    %90 = vector.broadcast %11 : f32 to vector<2x256xf32>
    %91 = arith.mulf %90, %88 : vector<2x256xf32>
    %92 = vector.broadcast %20 : f32 to vector<2x256xf32>
    %93 = arith.mulf %92, %89 : vector<2x256xf32>
    %94 = arith.addf %91, %93 : vector<2x256xf32>
    %c6_24 = arith.constant 6 : index
    %c0_25 = arith.constant 0 : index
    %95 = vector.load %arg2[%c6_24, %c0_25] : memref<9x256xf32, #tpu.memory_space<vmem>>, vector<1x256xf32>
    %96 = vector.broadcast %95 : vector<1x256xf32> to vector<2x256xf32>
    %97 = arith.mulf %94, %96 : vector<2x256xf32>
    %98 = arith.addf %87, %97 : vector<2x256xf32>
    %c240_i32 = arith.constant 240 : i32
    %99 = tpu.dynamic_rotate %3 by %c240_i32 dim 1 : vector<2x256xf32>, i32 -> vector<2x256xf32>
    %c240_i32_26 = arith.constant 240 : i32
    %100 = tpu.dynamic_rotate %4 by %c240_i32_26 dim 1 : vector<2x256xf32>, i32 -> vector<2x256xf32>
    %101 = vector.broadcast %12 : f32 to vector<2x256xf32>
    %102 = arith.mulf %101, %99 : vector<2x256xf32>
    %103 = vector.broadcast %21 : f32 to vector<2x256xf32>
    %104 = arith.mulf %103, %100 : vector<2x256xf32>
    %105 = arith.addf %102, %104 : vector<2x256xf32>
    %c7_27 = arith.constant 7 : index
    %c0_28 = arith.constant 0 : index
    %106 = vector.load %arg2[%c7_27, %c0_28] : memref<9x256xf32, #tpu.memory_space<vmem>>, vector<1x256xf32>
    %107 = vector.broadcast %106 : vector<1x256xf32> to vector<2x256xf32>
    %108 = arith.mulf %105, %107 : vector<2x256xf32>
    %109 = arith.addf %98, %108 : vector<2x256xf32>
    %c239_i32 = arith.constant 239 : i32
    %110 = tpu.dynamic_rotate %3 by %c239_i32 dim 1 : vector<2x256xf32>, i32 -> vector<2x256xf32>
    %c239_i32_29 = arith.constant 239 : i32
    %111 = tpu.dynamic_rotate %4 by %c239_i32_29 dim 1 : vector<2x256xf32>, i32 -> vector<2x256xf32>
    %112 = vector.broadcast %13 : f32 to vector<2x256xf32>
    %113 = arith.mulf %112, %110 : vector<2x256xf32>
    %114 = vector.broadcast %22 : f32 to vector<2x256xf32>
    %115 = arith.mulf %114, %111 : vector<2x256xf32>
    %116 = arith.addf %113, %115 : vector<2x256xf32>
    %c8_30 = arith.constant 8 : index
    %c0_31 = arith.constant 0 : index
    %117 = vector.load %arg2[%c8_30, %c0_31] : memref<9x256xf32, #tpu.memory_space<vmem>>, vector<1x256xf32>
    %118 = vector.broadcast %117 : vector<1x256xf32> to vector<2x256xf32>
    %119 = arith.mulf %116, %118 : vector<2x256xf32>
    %120 = arith.addf %109, %119 : vector<2x256xf32>
    %121 = arith.negf %120 : vector<2x256xf32>
    %122 = math.exp %121 : vector<2x256xf32>
    %cst_32 = arith.constant 1.000000e+00 : f32
    %123 = vector.broadcast %cst_32 : f32 to vector<2x256xf32>
    %124 = arith.addf %123, %122 : vector<2x256xf32>
    %125 = arith.divf %123, %124 : vector<2x256xf32>
    %cst_33 = arith.constant 1.000000e+00 : f32
    %126 = vector.broadcast %cst_33 : f32 to vector<2x256xf32>
    %127 = arith.addf %126, %125 : vector<2x256xf32>
    %c0_34 = arith.constant 0 : index
    %c0_35 = arith.constant 0 : index
    %c0_36 = arith.constant 0 : index
    %128 = vector.load %arg3[%c0_34, %c0_35, %c0_36] : memref<2x4x256xf32, #tpu.memory_space<vmem>>, vector<2x4x256xf32>
    %129 = vector.shape_cast %127 : vector<2x256xf32> to vector<2x1x256xf32>
    %130 = vector.broadcast %129 : vector<2x1x256xf32> to vector<2x4x256xf32>
    %131 = arith.mulf %128, %130 : vector<2x4x256xf32>
    %c0_37 = arith.constant 0 : index
    %c0_38 = arith.constant 0 : index
    %c0_39 = arith.constant 0 : index
    %132 = vector.load %arg4[%c0_37, %c0_38, %c0_39] : memref<2x4x256xf32, #tpu.memory_space<vmem>>, vector<2x4x256xf32>
    tpu.vector_store %arg4[%c0_37, %c0_38, %c0_39], %131 {strides = array<i32>} : memref<2x4x256xf32, #tpu.memory_space<vmem>>, vector<2x4x256xf32>,
    return
  }
  func.func @transform_0(%arg0: i32) -> i32 {
    %c0_i32 = arith.constant 0 : i32
    %c0_i32_0 = arith.constant 0 : i32
    return %c0_i32 : i32
  }
  func.func @transform_1(%arg0: i32) -> (i32, i32) {
    %c0_i32 = arith.constant 0 : i32
    %c0_i32_0 = arith.constant 0 : i32
    %c0_i32_1 = arith.constant 0 : i32
    return %c0_i32, %c0_i32_0 : i32, i32
  }
  func.func @transform_2(%arg0: i32) -> (i32, i32, i32) {
    %c0_i32 = arith.constant 0 : i32
    %c0_i32_0 = arith.constant 0 : i32
    %c0_i32_1 = arith.constant 0 : i32
    return %arg0, %c0_i32, %c0_i32_0 : i32, i32, i32
  }
  func.func @transform_3(%arg0: i32) -> (i32, i32, i32) {
    %c0_i32 = arith.constant 0 : i32
    %c0_i32_0 = arith.constant 0 : i32
    %c0_i32_1 = arith.constant 0 : i32
    return %arg0, %c0_i32, %c0_i32_0 : i32, i32, i32
  }
}

</mosaic_0001>

<bundles_post_ra>
// kernel: tpu_custom_call.1
= control target key start
LH: loop header
LB: loop body
LE: loop exit
PB: predicated region body
PF: predicated region fallthrough
CT: control target
= control target key end

     0   :  { %8 = vsyncpa [#allocation5], 0  ;;  %s1014_s0 = inlined_call_operand.hbm [shape: f32[18], index: 0, kind: input, shape index: {}]   ;;  %s1015_s1 = inlined_call_operand.hbm [shape: f32[9,256], index: 1, kind: input, shape index: {}]   ;;  %s1016_s2 = inlined_call_operand.hbm [shape: f32[2,4,256], index: 2, kind: input, shape index: {}]   ;;  %s1017_s3 = inlined_call_operand.hbm [shape: f32[2,4,256], index: 3, kind: output, shape index: {}]  }
   0x1   :  { %9 = vsyncpa [#allocation3], 0 }
   0x2   :  { %10 = vsyncpa [#allocation8], 0 }
   0x3   :  { %11 = vsyncpa [#allocation4], 0  ;;  %s17_s14 = sshll.u32 %s1014_s0, 4  ;;  %s25_s17 = sshll.u32 %s1015_s1, 4  ;;  %s18_s14 = int_to_ptr.hbm [resolvable:$true] %s17_s14  ;;  %s26_s17 = int_to_ptr.hbm [resolvable:$true] %s25_s17 }
   0x4   :  { %s692_s18 = smov [#allocation2]   ;;  %s693_s19 = smov [#allocation6]  }
   0x5   :  { %20 = dma.hbm_to_smem %s18_s14, 16, %s692_s18, [#allocation5]  }
   0x6   :  { %s27_s20 = sshll.u32 %s693_s19, 4  ;;  %s694_s21 = smov 256   ;;  %s28_s20 = int_to_ptr.vmem [resolvable:$true] %s27_s20 }
   0x7   :  { %s695_s22 = smov 16   ;;  %s38_s25 = sshll.u32 %s1016_s2, 4  ;;  %s39_s25 = int_to_ptr.hbm [resolvable:$true] %s38_s25 }
   0x8   :  { %33 = dma.hbm_to_vmem [thread:$0]  %s26_s17, 512, %s28_s20, [#allocation3], %s694_s21, %s694_s21, %s695_s22  }
   0x9   :  { %s696_s0 = smov [#allocation7]   ;;  %s697_s27 = smov 128  }
   0xa   :  { %s40_s26 = sshll.u32 %s696_s0, 4  ;;  %s698_s1 = smov 8   ;;  %s41_s26 = int_to_ptr.vmem [resolvable:$true] %s40_s26 }
   0xb   :  { %46 = dma.hbm_to_vmem [thread:$0]  %s39_s25, 256, %s41_s26, [#allocation8], %s697_s27, %s697_s27, %s698_s1  }
   0xc   :  { %684 = dma.done.wait [#allocation5], 16  }
   0xd   :  { %685 = vsyncadd [#allocation5], 4294967280 }
   0xe   :  { %686 = dma.done.wait [#allocation3], 512  }
   0xf   :  { %687 = vsyncadd [#allocation3], 4294966784 }
  0x10   :  { %688 = dma.done.wait [#allocation8], 256  }
  0x11   :  { %689 = vsyncadd [#allocation8], 4294967040 }
  0x12   :  { %59 = sfence }
  0x13   :  { %v740_v0 = vld [vmem:[#allocation7] sm:$0xff]  ;;  %v742_v1 = vld [vmem:[#allocation7 + $0x8] sm:$0xff]  ;;  %vm75_vm0 = vcmask 1043456   ;;  %vm169_vm1 = vcmask 1041409   ;;  %s699_s2 = smov 17   ;;  %s700_s28 = smov 15  }
  0x14   :  { %64 = vst [vmem:[#allocation1] ss:$2 sm:$0xff] %v740_v0  ;;  %s701_s29 = smov 1   ;;  %s702_s30 = smov 127  }
  0x15   :  { %68 = vst [vmem:[#allocation1 + $0x10] ss:$2 sm:$0xff] %v742_v1  ;;  %s703_s4 = smov 113   ;;  %s704_s5 = smov 112  }
  0x16   :  { %s705_s6 = smov 111   ;;  %s147_s7 = sld [smem:[#allocation2]] }
  0x17   :  { %s566_s8 = sld [smem:[#allocation2 + $0x9]]  ;;  %s706_s25 = smov [#allocation9]  }
  0x18   :  { %s558_s9 = sld [smem:[#allocation2 + $0x1]]  ;;  %s541_s0 = sshll.u32 %s706_s25, 4  ;;  %s542_s0 = int_to_ptr.vmem [resolvable:$true] %s541_s0 }
  0x19   :  { %s561_s10 = sld [smem:[#allocation2 + $0x4]] }
  0x1a   :  { %s570_s11 = sld [smem:[#allocation2 + $0xd]] }
  0x1b   :  { %v65_v2 = vld.sshfl [vmem:[#allocation1] sm:$0xff pattern:$0x75316420]  ;;  %v66_v3 = vld.sshfl [vmem:[#allocation1 + $0x8] sm:$0xff pattern:$0x75316420] }
  0x1c   :  { %v69_v4 = vld.sshfl [vmem:[#allocation1 + $0x10] sm:$0xff pattern:$0x75316420]  ;;  %v70_v5 = vld.sshfl [vmem:[#allocation1 + $0x18] sm:$0xff pattern:$0x75316420] }
  0x1d   :  { %v76_v6 = vsel %vm75_vm0, %v65_v2, 0.0  ;;  %v90_v7 = vsel %vm75_vm0, %v69_v4, 0.0  ;;  %108 = vst [vmem:[#allocation1] ss:$2 sm:$0xff] %v740_v0  ;;  %v83_v8 = vsel %vm75_vm0, %v66_v3, 0.0  ;;  %v97_v9 = vsel %vm75_vm0, %v70_v5, 0.0 }
  0x1e   :  { %v77_v10 = vrot.slane %v76_v6, 4  ;;  %v91_v11 = vrot.slane %v90_v7, 4  ;;  %112 = vst [vmem:[#allocation1 + $0x10] ss:$2 sm:$0xff] %v742_v1  ;;  %v84_v12 = vrot.slane %v83_v8, 4  ;;  %v98_v13 = vrot.slane %v97_v9, 4 }
  0x1f   :  { %s809_s12 = sld [smem:[#allocation2 + $0x2]] }
  0x20   :  { %v78_v14 = vadd.f32 %v77_v10, %v76_v6  ;;  %v92_v15 = vadd.f32 %v91_v11, %v90_v7  ;;  %v85_v16 = vadd.f32 %v84_v12, %v83_v8  ;;  %v99_v17 = vadd.f32 %v98_v13, %v97_v9  ;;  %s811_s13 = sld [smem:[#allocation2 + $0xa]] }
  0x21   :  { %s814_s14 = sld [smem:[#allocation2 + $0xb]] }
  0x22   :  { %v79_v18 = vrot.slane %v78_v14, 2  ;;  %v93_v19 = vrot.slane %v92_v15, 2  ;;  %v86_v20 = vrot.slane %v85_v16, 2  ;;  %v100_v21 = vrot.slane %v99_v17, 2  ;;  %s836_s15 = sld [smem:[#allocation2 + $0x3]] }
  0x23   :  { %s843_s16 = sld [smem:[#allocation2 + $0xc]] }
  0x24   :  { %v80_v22 = vadd.f32 %v79_v18, %v78_v14  ;;  %v94_v23 = vadd.f32 %v93_v19, %v92_v15  ;;  %v109_v24 = vld.sshfl [vmem:[#allocation1] sm:$0xff pattern:$0x75316420]  ;;  %v87_v25 = vadd.f32 %v86_v20, %v85_v16  ;;  %v101_v26 = vadd.f32 %v100_v21, %v99_v17  ;;  %v110_v27 = vld.sshfl [vmem:[#allocation1 + $0x8] sm:$0xff pattern:$0x75316420] }
  0x25   :  { %v113_v28 = vld.sshfl [vmem:[#allocation1 + $0x10] sm:$0xff pattern:$0x75316420]  ;;  %v119_v29 = vsel %vm75_vm0, %v109_v24, -inf  ;;  %v126_v30 = vsel %vm75_vm0, %v110_v27, -inf  ;;  %v178_v14 = vlaneseq  ;;  %v197_v20 = vstv %s147_s7  ;;  %s859_s17 = sld [smem:[#allocation2 + $0x5]] }
  0x26   :  { %v81_v31 = vrot.slane %v80_v22, 1  ;;  %v95_v32 = vrot.slane %v94_v23, 1  ;;  %v120_v33 = vrot.slane %v119_v29, 4  ;;  %v133_v34 = vsel %vm75_vm0, %v113_v28, -inf  ;;  %s872_s18 = sld [smem:[#allocation2 + $0xe]] }
  0x27   :  { %v134_v35 = vrot.slane %v133_v34, 4  ;;  %v88_v36 = vrot.slane %v87_v25, 1  ;;  %v102_v37 = vrot.slane %v101_v26, 1  ;;  %v114_v38 = vld.sshfl [vmem:[#allocation1 + $0x18] sm:$0xff pattern:$0x75316420] }
  0x28   :  { %v82_v39 = vadd.f32 %v81_v31, %v80_v22  ;;  %v96_v40 = vadd.f32 %v95_v32, %v94_v23  ;;  %v121_v41 = vmax.f32 %v119_v29, %v120_v33  ;;  %v127_v42 = vrot.slane %v126_v30, 4  ;;  %s887_s19 = sld [smem:[#allocation2 + $0x6]] }
  0x29   :  { %v135_v43 = vmax.f32 %v133_v34, %v134_v35  ;;  %v89_v44 = vadd.f32 %v88_v36, %v87_v25  ;;  %v103_v45 = vadd.f32 %v102_v37, %v101_v26  ;;  %v140_v46 = vsel %vm75_vm0, %v114_v38, -inf  ;;  %s892_s20 = sld [smem:[#allocation2 + $0xf]] }
  0x2a   :  { %v756_v47 = vmul.f32 0.25, %v82_v39  ;;  %v758_v48 = vmul.f32 0.25, %v96_v40  ;;  %v122_v49 = vrot.slane %v121_v41, 2  ;;  %v128_v50 = vmax.f32 %v126_v30, %v127_v42  ;;  %s911_s21 = sld [smem:[#allocation2 + $0x7]] }
  0x2b   :  { %v136_v51 = vrot.slane %v135_v43, 2  ;;  %v141_v52 = vrot.slane %v140_v46, 4  ;;  %v764_v59 = vmul.f32 0.25, %v89_v44  ;;  %v766_v60 = vmul.f32 0.25, %v103_v45  ;;  %s968_s23 = sld [smem:[#allocation2 + $0x8]] }
  0x2c   :  { %v170_v53 = vsel %vm169_vm1, %v758_v48, %v756_v47  ;;  %v123_v54 = vmax.f32 %v121_v41, %v122_v49  ;;  %v129_v55 = vrot.slane %v128_v50, 2  ;;  %v788_v17 = vand.u32 127, %v178_v14  ;;  %v820_v45 = vld [vmem:[#allocation6] ss:$8 sm:$0x3]  ;;  %s978_s24 = sld [smem:[#allocation2 + $0x11]] }
  0x2d   :  { %174 = vrot.lane.b32.xlu0 %v170_v53, %s699_s2  ;;  %v137_v56 = vmax.f32 %v135_v43, %v136_v51  ;;  %v142_v57 = vmax.f32 %v140_v46, %v141_v52  ;;  %215 = vrot.lane.b32.xlu2 %v170_v53, %s695_s22  ;;  %v171_v6 = vsel %vm169_vm1, %v766_v60, %v764_v59  ;;  %v200_v23 = vstv %s566_s8  ;;  %v826_v51 = vld [vmem:[#allocation6 + $0x1] ss:$8 sm:$0x3] }
  0x2e   :  { %v124_v58 = vrot.slane %v123_v54, 1  ;;  %v130_v61 = vmax.f32 %v128_v50, %v129_v55  ;;  %vm180_vm2 = vcmp.lt.s32.totalorder %v788_v17, 17  ;;  %vm219_vm3 = vcmp.lt.s32.totalorder %v788_v17, 16 }
  0x2f   :  { %v138_v62 = vrot.slane %v137_v56, 1  ;;  %v143_v63 = vrot.slane %v142_v57, 2  ;;  %v228_v46 = vstv %s558_s9  ;;  %v311_v52 = vstv %s561_s10 }
  0x30   :  { %v768_v2 = vmax.f32 %v123_v54, %v124_v58  ;;  %v131_v4 = vrot.slane %v130_v61, 1  ;;  %v207_v54 = vperm.slane %v820_v45, 0  ;;  %v208_v55 = vperm.slane %v820_v45, 1 }
  0x31   :  { %v770_v3 = vmax.f32 %v137_v56, %v138_v62  ;;  %v144_v5 = vmax.f32 %v142_v57, %v143_v63  ;;  %vm251_vm4 = vcmp.lt.s32.totalorder %v788_v17, 15  ;;  %v231_v62 = vstv %s811_s13 }
  0x32   :  { %v778_v9 = vmax.f32 %v130_v61, %v131_v4  ;;  %v260_v61 = vstv %s809_s12  ;;  %v239_v63 = vperm.slane %v826_v51, 0  ;;  %v315_v14 = vmul.f32 %v311_v52, %v766_v60 }
  0x33   :  { %v187_v7 = vsel %vm169_vm1, %v770_v3, %v768_v2  ;;  %v145_v8 = vrot.slane %v144_v5, 1  ;;  %vm283_vm5 = vcmp.lt.s32.totalorder %v788_v17, 1  ;;  %vm352_vm6 = vcmp.lt.s32.totalorder %v788_v17, 127 }
  0x34   :  { %191 = vrot.lane.b32.xlu1 %v187_v7, %s699_s2  ;;  %vm384_vm7 = vcmp.lt.s32.totalorder %v788_v17, 113  ;;  %vm416_vm8 = vcmp.lt.s32.totalorder %v788_v17, 112  ;;  %vm448_vm9 = vcmp.lt.s32.totalorder %v788_v17, 111 }
  0x35   :  { %176 = vrot.lane.b32.xlu0 %v171_v6, %s699_s2  ;;  %v780_v10 = vmax.f32 %v144_v5, %v145_v8  ;;  %217 = vrot.lane.b32.xlu2 %v171_v6, %s695_s22  ;;  %v263_v5 = vstv %s814_s14 }
  0x37   :  { %v188_v11 = vsel %vm169_vm1, %v780_v10, %v778_v9 }
  0x3c   :  { %193 = vrot.lane.b32.xlu1 %v188_v11, %s699_s2 }
  0x3d   :  { %249 = vrot.lane.b32.xlu0 %v171_v6, %s700_s28  ;;  %247 = vrot.lane.b32.xlu2 %v170_v53, %s700_s28 }
  0x44   :  { %224 = vrot.lane.b32.xlu1 %v188_v11, %s695_s22 }
  0x45   :  { %222 = vrot.lane.b32.xlu0 %v187_v7, %s695_s22  ;;  %256 = vrot.lane.b32.xlu2 %v188_v11, %s700_s28  ;;  %s919_s22 = sld [smem:[#allocation2 + $0x10]] }
  0x4c   :  { %254 = vrot.lane.b32.xlu1 %v187_v7, %s700_s28  ;;  %s543_s28 = sshll.u32 %s1017_s3, 4  ;;  %s544_s28 = int_to_ptr.hbm [resolvable:$true] %s543_s28 }
  0x4d   :  { %279 = vrot.lane.b32.xlu0 %v170_v53, %s701_s29  ;;  %286 = vrot.lane.b32.xlu2 %v187_v7, %s701_s29 }
  0x54   :  { %281 = vrot.lane.b32.xlu1 %v171_v6, %s701_s29 }
  0x55   :  { %288 = vrot.lane.b32.xlu0 %v188_v11, %s701_s29  ;;  %350 = vrot.lane.b32.xlu2 %v171_v6, %s702_s30 }
  0x5c   :  { %348 = vrot.lane.b32.xlu1 %v170_v53, %s702_s30 }
  0x5d   :  { %355 = vrot.lane.b32.xlu0 %v187_v7, %s702_s30  ;;  %380 = vrot.lane.b32.xlu2 %v170_v53, %s703_s4 }
  0x64   :  { %357 = vrot.lane.b32.xlu1 %v188_v11, %s702_s30 }
  0x65   :  { %382 = vrot.lane.b32.xlu0 %v171_v6, %s703_s4  ;;  %389 = vrot.lane.b32.xlu2 %v188_v11, %s703_s4 }
  0x6c   :  { %387 = vrot.lane.b32.xlu1 %v187_v7, %s703_s4 }
  0x6d   :  { %412 = vrot.lane.b32.xlu0 %v170_v53, %s704_s5  ;;  %419 = vrot.lane.b32.xlu2 %v187_v7, %s704_s5 }
  0x74   :  { %414 = vrot.lane.b32.xlu1 %v171_v6, %s704_s5 }
  0x75   :  { %421 = vrot.lane.b32.xlu0 %v188_v11, %s704_s5  ;;  %446 = vrot.lane.b32.xlu2 %v171_v6, %s705_s6  ;;  %v841_v6 = vld [vmem:[#allocation6 + $0x2] ss:$8 sm:$0x3] }
  0x7c   :  { %444 = vrot.lane.b32.xlu1 %v170_v53, %s705_s6  ;;  %v316_v53 = vstv %s570_s11 }
  0x7d   :  { %451 = vrot.lane.b32.xlu0 %v187_v7, %s705_s6  ;;  %v314_v7 = vmul.f32 %v311_v52, %v758_v48  ;;  %v319_v8 = vmul.f32 %v316_v53, %v770_v3  ;;  %v318_v3 = vmul.f32 %v316_v53, %v778_v9 }
  0x7f   :  { %v323_v9 = vadd.f32 %v319_v8, %v314_v7 }
  0x84   :  { %453 = vrot.lane.b32.xlu1 %v188_v11, %s705_s6 }
  0x87   :  { %v216_v12 = vpop.permute.xlu2 %215 }
  0x8f   :  { %v218_v15 = vpop.permute.xlu2 %217 }
  0x90   :  { %v220_v49 = vsel %vm219_vm3, %v216_v12, %v218_v15  ;;  %v221_v50 = vsel %vm219_vm3, %v218_v15, %v216_v12  ;;  %v312_v12 = vmul.f32 %v311_v52, %v756_v47  ;;  %v317_v15 = vmul.f32 %v316_v53, %v768_v2 }
  0x91   :  { %v229_v56 = vmul.f32 %v228_v46, %v221_v50  ;;  %v230_v57 = vmul.f32 %v228_v46, %v220_v49  ;;  %v320_v47 = vmul.f32 %v316_v53, %v780_v10  ;;  %v271_v2 = vperm.slane %v841_v6, 0 }
  0x92   :  { %v292_v46 = vstv %s836_s15  ;;  %v295_v49 = vstv %s843_s16 }
  0x97   :  { %v791_v19 = vpop.permute.xlu2 %247 }
  0x9f   :  { %v175_v13 = vpop.permute.xlu0 %174  ;;  %v257_v35 = vpop.permute.xlu2 %256 }
  0xa6   :  { %v192_v16 = vpop.permute.xlu1 %191 }
  0xa7   :  { %v177_v18 = vpop.permute.xlu0 %176  ;;  %v801_v39 = vpop.permute.xlu2 %286 }
  0xa8   :  { %v181_v21 = vsel %vm180_vm2, %v175_v13, %v177_v18  ;;  %v182_v22 = vsel %vm180_vm2, %v177_v18, %v175_v13  ;;  %v313_v13 = vmul.f32 %v311_v52, %v764_v59  ;;  %v240_v59 = vperm.slane %v826_v51, 1 }
  0xa9   :  { %v198_v28 = vmul.f32 %v197_v20, %v182_v22  ;;  %v199_v29 = vmul.f32 %v197_v20, %v181_v21  ;;  %v272_v21 = vperm.slane %v841_v6, 1  ;;  %v361_v6 = vstv %s859_s17 }
  0xae   :  { %v194_v24 = vpop.permute.xlu1 %193 }
  0xaf   :  { %v195_v25 = vsel %vm180_vm2, %v192_v16, %v194_v24  ;;  %v196_v26 = vsel %vm180_vm2, %v194_v24, %v192_v16  ;;  %v793_v27 = vpop.permute.xlu0 %249  ;;  %v807_v42 = vpop.permute.xlu2 %350  ;;  %v326_v16 = vld [vmem:[#allocation6 + $0x4] ss:$8 sm:$0x3] }
  0xb0   :  { %v201_v30 = vmul.f32 %v200_v23, %v196_v26  ;;  %v202_v31 = vmul.f32 %v200_v23, %v195_v25  ;;  %v253_v22 = vsel %vm251_vm4, %v793_v27, %v791_v19  ;;  %v328_v10 = vperm.slane %v326_v16, 0  ;;  %v875_v26 = vld [vmem:[#allocation6 + $0x3] ss:$8 sm:$0x3] }
  0xb1   :  { %v303_v50 = vperm.slane %v875_v26, 0  ;;  %v304_v51 = vperm.slane %v875_v26, 1 }
  0xb2   :  { %v795_v32 = vadd.f32 %v201_v30, %v198_v28  ;;  %v797_v33 = vadd.f32 %v202_v31, %v199_v29  ;;  %v329_v28 = vperm.slane %v326_v16, 1  ;;  %v252_v29 = vsel %vm251_vm4, %v791_v19, %v793_v27 }
  0xb3   :  { %v321_v30 = vadd.f32 %v317_v15, %v312_v12  ;;  %v322_v31 = vadd.f32 %v318_v3, %v313_v13  ;;  %v885_v52 = vmul.f32 %v328_v10, %v323_v9  ;;  %v262_v19 = vmul.f32 %v260_v61, %v252_v29 }
  0xb4   :  { %v211_v15 = vmul.f32 %v207_v54, %v795_v32  ;;  %v212_v32 = vmul.f32 %v208_v55, %v797_v33 }
  0xb5   :  { %v897_v7 = vmul.f32 %v328_v10, %v321_v30  ;;  %v899_v8 = vmul.f32 %v329_v28, %v322_v31  ;;  %v340_v16 = vrot.slane %v885_v52, 7  ;;  %v396_v10 = vstv %s892_s20 }
  0xb6   :  { %v225_v34 = vpop.permute.xlu1 %224 }
  0xb7   :  { %v223_v36 = vpop.permute.xlu0 %222  ;;  %v830_v58 = vpop.permute.xlu2 %380 }
  0xb8   :  { %v227_v4 = vsel %vm219_vm3, %v225_v34, %v223_v36  ;;  %v226_v20 = vsel %vm219_vm3, %v223_v36, %v225_v34  ;;  %v324_v34 = vadd.f32 %v320_v47, %v315_v14 }
  0xb9   :  { %v232_v60 = vmul.f32 %v231_v62, %v227_v4  ;;  %v233_v24 = vmul.f32 %v231_v62, %v226_v20 }
  0xba   :  { %v901_v12 = vmul.f32 %v329_v28, %v324_v34 }
  0xbb   :  { %v234_v36 = vadd.f32 %v232_v60, %v229_v56  ;;  %v235_v27 = vadd.f32 %v233_v24, %v230_v57  ;;  %v890_v56 = vld [vmem:[#allocation6 + $0x5] ss:$8 sm:$0x3] }
  0xbc   :  { %v372_v20 = vperm.slane %v890_v56, 0 }
  0xbd   :  { %v243_v13 = vmul.f32 %v239_v63, %v234_v36  ;;  %v364_v63 = vstv %s872_s18 }
  0xbe   :  { %v255_v37 = vpop.permute.xlu1 %254 }
  0xbf   :  { %v799_v38 = vpop.permute.xlu0 %279  ;;  %v259_v48 = vsel %vm251_vm4, %v257_v35, %v255_v37  ;;  %v258_v23 = vsel %vm251_vm4, %v255_v37, %v257_v35  ;;  %v261_v35 = vmul.f32 %v260_v61, %v253_v22  ;;  %v390_v62 = vpop.permute.xlu2 %389  ;;  %v245_v60 = vadd.f32 %v243_v13, %v211_v15 }
  0xc0   :  { %v264_v25 = vmul.f32 %v263_v5, %v259_v48  ;;  %v265_v37 = vmul.f32 %v263_v5, %v258_v23  ;;  %v244_v48 = vmul.f32 %v240_v59, %v235_v27  ;;  %v373_v59 = vperm.slane %v890_v56, 1 }
  0xc1   :  { %v342_v22 = vrot.slane %v901_v12, 7  ;;  %vm519_vm4 = vcmask 1040384  }
  0xc2   :  { %v266_v4 = vadd.f32 %v264_v25, %v261_v35  ;;  %v267_v61 = vadd.f32 %v265_v37, %v262_v19  ;;  %v246_v45 = vadd.f32 %v244_v48, %v212_v32  ;;  %v425_v37 = vstv %s911_s21 }
  0xc4   :  { %v275_v3 = vmul.f32 %v271_v2, %v266_v4  ;;  %v276_v2 = vmul.f32 %v272_v21, %v267_v61  ;;  %v393_v21 = vstv %s887_s19 }
  0xc6   :  { %v803_v40 = vpop.permute.xlu1 %281  ;;  %v277_v55 = vadd.f32 %v275_v3, %v245_v60  ;;  %v343_v3 = vsel %vm169_vm1, %v342_v22, %v899_v8 }
  0xc7   :  { %v805_v41 = vpop.permute.xlu0 %288 }
  0xc8   :  { %v290_v57 = vsel %vm283_vm5, %v801_v39, %v805_v41  ;;  %v291_v14 = vsel %vm283_vm5, %v805_v41, %v801_v39  ;;  %v284_v39 = vsel %vm283_vm5, %v799_v38, %v803_v40  ;;  %v285_v41 = vsel %vm283_vm5, %v803_v40, %v799_v38 }
  0xc9   :  { %v296_v54 = vmul.f32 %v295_v49, %v291_v14  ;;  %v297_v47 = vmul.f32 %v295_v49, %v290_v57  ;;  %v293_v23 = vmul.f32 %v292_v46, %v285_v41  ;;  %v294_v9 = vmul.f32 %v292_v46, %v284_v39  ;;  %v434_v41 = vld [vmem:[#allocation6 + $0x7] ss:$8 sm:$0x3] }
  0xca   :  { %v428_v46 = vstv %s919_s22  ;;  %v341_v57 = vsel %vm169_vm1, %v340_v16, %v897_v7 }
  0xcb   :  { %v298_v24 = vadd.f32 %v296_v54, %v293_v23  ;;  %v299_v25 = vadd.f32 %v297_v47, %v294_v9  ;;  %v466_v23 = vld [vmem:[#allocation6 + $0x10] ss:$8 sm:$0x3]  ;;  %v436_v9 = vperm.slane %v434_v41, 0 }
  0xcd   :  { %v307_v19 = vmul.f32 %v303_v50, %v298_v24  ;;  %v308_v27 = vmul.f32 %v304_v51, %v299_v25 }
  0xce   :  { %v816_v43 = vpop.permute.xlu1 %348 }
  0xcf   :  { %v818_v44 = vpop.permute.xlu0 %355  ;;  %v353_v28 = vsel %vm352_vm6, %v816_v43, %v807_v42  ;;  %v354_v29 = vsel %vm352_vm6, %v807_v42, %v816_v43 }
  0xd0   :  { %v362_v42 = vmul.f32 %v361_v6, %v353_v28  ;;  %v363_v43 = vmul.f32 %v361_v6, %v354_v29 }
  0xd6   :  { %v847_v11 = vpop.permute.xlu1 %357 }
  0xd7   :  { %v853_v18 = vpop.permute.xlu0 %382  ;;  %v359_v38 = vsel %vm352_vm6, %v818_v44, %v847_v11  ;;  %v360_v33 = vsel %vm352_vm6, %v847_v11, %v818_v44  ;;  %v420_v44 = vpop.permute.xlu2 %419  ;;  %v278_v11 = vadd.f32 %v276_v2, %v246_v45  ;;  %v457_v45 = vstv %s968_s23 }
  0xd8   :  { %v365_v30 = vmul.f32 %v364_v63, %v359_v38  ;;  %v366_v31 = vmul.f32 %v364_v63, %v360_v33  ;;  %v385_v35 = vsel %vm384_vm7, %v830_v58, %v853_v18  ;;  %v386_v36 = vsel %vm384_vm7, %v853_v18, %v830_v58 }
  0xd9   :  { %v394_v12 = vmul.f32 %v393_v21, %v385_v35  ;;  %v309_v63 = vadd.f32 %v307_v19, %v277_v55  ;;  %v310_v48 = vadd.f32 %v308_v27, %v278_v11  ;;  %v437_v38 = vperm.slane %v434_v41, 1 }
  0xda   :  { %v367_v4 = vadd.f32 %v365_v30, %v362_v42  ;;  %v368_v6 = vadd.f32 %v366_v31, %v363_v43  ;;  %v460_v55 = vstv %s978_s24 }
  0xdb   :  { %v346_v33 = vadd.f32 %v341_v57, %v309_v63 }
  0xdc   :  { %v377_v7 = vmul.f32 %v373_v59, %v368_v6  ;;  %v469_v59 = vperm.slane %v466_v23, 1 }
  0xde   :  { %v388_v53 = vpop.permute.xlu1 %387 }
  0xdf   :  { %v894_v5 = vpop.permute.xlu0 %412  ;;  %v391_v49 = vsel %vm384_vm7, %v388_v53, %v390_v62  ;;  %v392_v52 = vsel %vm384_vm7, %v390_v62, %v388_v53  ;;  %v395_v53 = vmul.f32 %v393_v21, %v386_v36  ;;  %v402_v62 = vld [vmem:[#allocation6 + $0x6] ss:$8 sm:$0x3]  ;;  %v447_v2 = vpop.permute.xlu2 %446 }
  0xe0   :  { %v397_v13 = vmul.f32 %v396_v10, %v391_v49  ;;  %v398_v61 = vmul.f32 %v396_v10, %v392_v52  ;;  %v404_v39 = vperm.slane %v402_v62, 0  ;;  %v405_v32 = vperm.slane %v402_v62, 1 }
  0xe2   :  { %v399_v16 = vadd.f32 %v397_v13, %v394_v12  ;;  %v400_v60 = vadd.f32 %v398_v61, %v395_v53 }
  0xe4   :  { %v408_v28 = vmul.f32 %v404_v39, %v399_v16  ;;  %v409_v29 = vmul.f32 %v405_v32, %v400_v60 }
  0xe6   :  { %v415_v40 = vpop.permute.xlu1 %414 }
  0xe7   :  { %v422_v34 = vpop.permute.xlu0 %421  ;;  %v417_v26 = vsel %vm416_vm8, %v894_v5, %v415_v40  ;;  %v418_v50 = vsel %vm416_vm8, %v415_v40, %v894_v5  ;;  %v376_v5 = vmul.f32 %v372_v20, %v367_v4  ;;  %v347_v40 = vadd.f32 %v343_v3, %v310_v48 }
  0xe8   :  { %v423_v58 = vsel %vm416_vm8, %v420_v44, %v422_v34  ;;  %v424_v18 = vsel %vm416_vm8, %v422_v34, %v420_v44  ;;  %v426_v54 = vmul.f32 %v425_v37, %v417_v26  ;;  %v427_v47 = vmul.f32 %v425_v37, %v418_v50 }
  0xe9   :  { %v429_v14 = vmul.f32 %v428_v46, %v423_v58  ;;  %v430_v15 = vmul.f32 %v428_v46, %v424_v18  ;;  %v468_v20 = vperm.slane %v466_v23, 0  ;;  %v378_v24 = vadd.f32 %v376_v5, %v346_v33 }
  0xea   :  { %v379_v25 = vadd.f32 %v377_v7, %v347_v40 }
  0xeb   :  { %v431_v8 = vadd.f32 %v429_v14, %v426_v54  ;;  %v432_v22 = vadd.f32 %v430_v15, %v427_v47  ;;  %v410_v42 = vadd.f32 %v408_v28, %v378_v24 }
  0xec   :  { %v411_v43 = vadd.f32 %v409_v29, %v379_v25 }
  0xed   :  { %v440_v11 = vmul.f32 %v436_v9, %v431_v8  ;;  %v441_v30 = vmul.f32 %v437_v38, %v432_v22 }
  0xee   :  { %v445_v51 = vpop.permute.xlu1 %444 }
  0xef   :  { %v452_v21 = vpop.permute.xlu0 %451  ;;  %v449_v10 = vsel %vm448_vm9, %v445_v51, %v447_v2  ;;  %v450_v56 = vsel %vm448_vm9, %v447_v2, %v445_v51  ;;  %v442_v19 = vadd.f32 %v440_v11, %v410_v42  ;;  %v443_v27 = vadd.f32 %v441_v30, %v411_v43 }
  0xf0   :  { %v458_v35 = vmul.f32 %v457_v45, %v449_v10  ;;  %v459_v36 = vmul.f32 %v457_v45, %v450_v56 }
  0xf6   :  { %v454_v44 = vpop.permute.xlu1 %453 }
  0xf7   :  { %v455_v31 = vsel %vm448_vm9, %v452_v21, %v454_v44  ;;  %v456_v34 = vsel %vm448_vm9, %v454_v44, %v452_v21 }
  0xf8   :  { %v461_v37 = vmul.f32 %v460_v55, %v455_v31  ;;  %v462_v46 = vmul.f32 %v460_v55, %v456_v34 }
  0xfa   :  { %v463_v49 = vadd.f32 %v461_v37, %v458_v35  ;;  %v464_v52 = vadd.f32 %v462_v46, %v459_v36 }
  0xfc   :  { %v472_v58 = vmul.f32 %v468_v20, %v463_v49  ;;  %v473_v18 = vmul.f32 %v469_v59, %v464_v52 }
  0xfe   :  { %v474_v4 = vadd.f32 %v472_v58, %v442_v19  ;;  %v475_v6 = vadd.f32 %v473_v18, %v443_v27 }
 0x100   :  { %v575_v12 = vmul.f32 -1.442695, %v474_v4  ;;  %v576_v53 = vmul.f32 -1.442695, %v475_v6 }
 0x102   :  { %592 = vpow2.f32 %v575_v12 }
 0x103   :  { %594 = vpow2.f32 %v576_v53 }
 0x108   :  { %v593_v17 = vpop.eup %592 }
 0x109   :  { %v595_v62 = vpop.eup %594  ;;  %v482_v13 = vadd.f32 1.0, %v593_v17 }
 0x10a   :  { %v483_v61 = vadd.f32 1.0, %v595_v62 }
 0x10b   :  { %596 = vrcp.f32 %v482_v13  ;;  %v495_v48 = vand.u32 2147483648, %v482_v13  ;;  %v493_v39 = vand.u32 2147483647, %v482_v13  ;;  %vm489_vm12 = vweird.f32 %v482_v13 }
 0x10c   :  { %598 = vrcp.f32 %v483_v61  ;;  %v510_v3 = vand.u32 2147483648, %v483_v61  ;;  %v508_v32 = vand.u32 2147483647, %v483_v61  ;;  %vm504_vm14 = vweird.f32 %v483_v61 }
 0x10d   :  { %v496_v7 = vor.u32 1.1754944e-38, %v495_v48  ;;  %vm494_vm2 = vcmp.eq.f32.partialorder %v493_v39, 8.507059e+37 }
 0x10e   :  { %v511_v16 = vor.u32 1.1754944e-38, %v510_v3  ;;  %vm509_vm3 = vcmp.eq.f32.partialorder %v508_v32, 8.507059e+37 }
 0x111   :  { %v597_v26 = vpop.eup %596 }
 0x112   :  { %v599_v50 = vpop.eup %598  ;;  %v485_v51 = vmul.f32 %v597_v26, %v482_v13  ;;  %vm490_vm10 = vweird.f32 %v597_v26 }
 0x113   :  { %v500_v57 = vmul.f32 %v599_v50, %v483_v61  ;;  %vm505_vm11 = vweird.f32 %v599_v50  ;;  %vm491_vm13 = vmor %vm489_vm12, %vm490_vm10 }
 0x114   :  { %v486_v14 = vsub.f32 1.0, %v485_v51  ;;  %vm506_vm15 = vmor %vm504_vm14, %vm505_vm11 }
 0x115   :  { %v501_v15 = vsub.f32 1.0, %v500_v57 }
 0x116   :  { %v487_v63 = vmul.f32 %v597_v26, %v486_v14 }
 0x117   :  { %v502_v41 = vmul.f32 %v599_v50, %v501_v15 }
 0x118   :  { %v488_v54 = vadd.f32 %v597_v26, %v487_v63 }
 0x119   :  { %v503_v47 = vadd.f32 %v599_v50, %v502_v41 }
 0x11a   :  { %v492_v5 = vsel %vm491_vm13, %v597_v26, %v488_v54 }
 0x11b   :  { %v507_v60 = vsel %vm506_vm15, %v599_v50, %v503_v47  ;;  %v497_v2 = vsel %vm494_vm2, %v496_v7, %v492_v5 }
 0x11c   :  { %v512_v23 = vsel %vm509_vm3, %v511_v16, %v507_v60  ;;  %v514_v38 = vadd.f32 1.0, %v497_v2 }
 0x11d   :  { %v515_v9 = vadd.f32 1.0, %v512_v23 }
 0x11f   :  { %v518_v8 = vrot.slane %v515_v9, 7 }
 0x121   :  { %v520_v22 = vsel %vm519_vm4, %v514_v38, %v518_v8  ;;  %v521_v33 = vsel %vm169_vm1, %v514_v38, %v518_v8 }
 0x122   :  { %v522_v40 = vrot.slane %v521_v33, 1  ;;  %v524_v45 = vperm.slane %v520_v22, 1  ;;  %v523_v55 = vperm.slane %v520_v22, 0 }
 0x124   :  { %v526_v21 = vperm.slane %v522_v40, 1  ;;  %v527_v10 = vrot.slane %v524_v45, 4  ;;  %v525_v56 = vperm.slane %v522_v40, 0 }
 0x126   :  { %v528_v20 = vrot.slane %v526_v21, 4  ;;  %v529_v59 = vsel %vm75_vm0, %v523_v55, %v527_v10 }
 0x127   :  { %v533_v24 = vmul.f32 %v529_v59, %v740_v0 }
 0x128   :  { %v530_v25 = vsel %vm75_vm0, %v525_v56, %v528_v20 }
 0x129   :  { %v534_v28 = vmul.f32 %v530_v25, %v742_v1  ;;  %535 = vst [vmem:[#allocation9] sm:$0xff] %v533_v24 }
 0x12b   :  { %536 = vst [vmem:[#allocation9 + $0x8] sm:$0xff] %v534_v28 }
 0x12c   :  { %549 = dma.vmem_to_hbm [thread:$0]  %s542_s0, 256, %s544_s28, [#allocation4], %s697_s27, %s697_s27, %s698_s1  }
 0x12d   :  { %690 = dma.done.wait [#allocation4], 256  }
 0x12e   :  { %691 = vsyncadd [#allocation4], 4294967040 }
 0x12f   :  { %554 = vsyncpa [#allocation3], 1 }
 0x130   :  { %555 = vsyncpa [#allocation8], 1 }
 0x131   :  { %556 = vsyncpa [#allocation4], 1 }
 0x132   :  { %557 = vsyncpa [#allocation5], 1 }

</bundles_post_ra>
